<compile_context>
chip_gen: v7x
topology: tpu7x:2x2x1
jax: 0.10.0
libtpu: 0.0.40
codegen_flags: <defaults>
</compile_context>

<pallas_src>
import functools
import math

import jax
import jax.numpy as jnp
from jax.experimental import pallas as pl
from jax.experimental.pallas import tpu as pltpu


# --------------------------------------------------------------------------- kernels
def _gem_rowsum_kernel(*refs, eps: float, inv_scale: float):
    """refs = (x_ref_0, ..., x_ref_{L-1}, o_ref); x_ref: (tr, HW), o_ref: (tr, 1)."""
    x_refs, o_ref = refs[:-1], refs[-1]
    acc = jnp.zeros(o_ref.shape, jnp.float32)
    for x_ref in x_refs:                                   # unrolled over the (small) list
        x = jnp.maximum(x_ref[...], eps)                   # clamp(min=eps) in input dtype
        acc = acc + jnp.sum(x, axis=-1, keepdims=True, dtype=jnp.float32)
    o_ref[...] = (acc * inv_scale).astype(o_ref.dtype)     # single 1/(HW*L) scale


def _gem_grouped_kernel(sel_ref, *refs, eps: float, inv_scale: float):
    """refs = (x_ref_0, ..., x_ref_{L-1}, o_ref).

    sel_ref: (g, g*HW) block-diagonal 0/1 selector; x_ref: (tr, g*HW); o_ref: (tr, g).
    Per-channel spatial sums computed as an MXU matmul over the lane-dense grouped row.
    """
    x_refs, o_ref = refs[:-1], refs[-1]
    sel = sel_ref[...]
    acc = jnp.zeros(o_ref.shape, jnp.float32)
    for x_ref in x_refs:
        x = jnp.maximum(x_ref[...], eps).astype(jnp.float32)   # clamp, then f32 for MXU
        acc = acc + jax.lax.dot_general(
            x, sel,
            dimension_numbers=(((1,), (1,)), ((), ())),        # contract the lane dim
            preferred_element_type=jnp.float32,
            precision=jax.lax.Precision.HIGHEST)
    o_ref[...] = (acc * inv_scale).astype(o_ref.dtype)


# ------------------------------------------------------------------- tiling utilities
def _round_up(x: int, m: int) -> int:
    return (x + m - 1) // m * m


def _sublane_multiple(dtype) -> int:
    # f32 -> 8, bf16 -> 16, int8/fp8 -> 32 (packed dtypes tile sublanes in pairs/quads).
    return max(8, 32 // jnp.dtype(dtype).itemsize)


def _padded_block_bytes(rows: int, cols: int, dtype) -> int:
    """Real (padded) VMEM footprint of a (rows, cols) block of `dtype`."""
    sm = _sublane_multiple(dtype)
    return _round_up(rows, sm) * _round_up(cols, 128) * jnp.dtype(dtype).itemsize


def _vmem_capacity_bytes() -> int:
    try:
        return int(pltpu.get_tpu_info().vmem_capacity_bytes)
    except Exception:
        return 64 << 20                     # conservative fallback (v7x per-core VMEM)


def _pick_row_tile(R: int, J: int, dtype, budget_bytes: int) -> int:
    """Largest row tile tr that divides R, is a multiple of the dtype sublane tile (or
    the full R), and keeps one *padded* per-input block under budget_bytes.  Prefers
    >= 2 grid steps (v7x dual-TensorCore sharding) when blocks stay a reasonable size."""
    sm = _sublane_multiple(dtype)
    cands = [d for d in range(sm, R + 1, sm) if R % d == 0]
    if R not in cands:
        cands.append(R)                                    # full-extent block always legal
    fitting = [d for d in cands if _padded_block_bytes(d, J, dtype) <= budget_bytes]
    if not fitting:
        return min(cands)                                  # best effort; vmem limit raised
    best = max(fitting)
    if best == R and R > 1:
        multi = [d for d in fitting if d < R]              # would give >= 2 grid steps
        if multi:
            alt = max(multi)
            if _padded_block_bytes(alt, J, dtype) >= (256 << 10) or alt * 8 >= R:
                best = alt
    return best


# --------------------------------------------------------------------------- wrapper
def generalized_mean_pooling_list(x_list, eps: float = 1e-6, block_bytes: int | None = None):
    """JAX/Pallas equivalent of GeneralizedMeanPoolingList(output_size=1).

    Args:
      x_list: sequence of arrays, each (N, C, H, W) with identical shapes/dtypes.
      eps: clamp floor.
      block_bytes: optional per-input padded VMEM block budget override (bytes).
    Returns:
      Array of shape (N, C, 1, 1).
    """
    x_list = list(x_list)
    L = len(x_list)
    if L == 0:
        raise ValueError("x_list must be non-empty")
    N, C, H, W = x_list[0].shape
    HW = H * W
    dtype = x_list[0].dtype
    itemsize = jnp.dtype(dtype).itemsize

    # ---- lane-dense channel grouping (only when lane padding would be heavy) --------
    g = 1
    if HW % 128 != 0:
        g_need = 128 // math.gcd(HW, 128)          # smallest g with (g*HW) % 128 == 0
        waste = _round_up(HW, 128) / HW            # vreg/DMA padding factor without grouping
        sel_bytes = g_need * g_need * HW * 4       # f32 selector footprint
        if g_need > 1 and C % g_need == 0 and waste >= 1.25 and sel_bytes <= (4 << 20):
            g = g_need
    J = g * HW                                     # row length (lane dim)
    R = (N * C) // g                               # independent rows (batch*channel groups)
    gout = g if g > 1 else 1

    # ---- VMEM budgeting with padded footprints + explicit scoped-VMEM limit ---------
    cap = _vmem_capacity_bytes()
    vmem_limit = min(cap // 2, 96 << 20)           # ~50% headroom over physical VMEM
    ones_bytes = _padded_block_bytes(g, J, jnp.float32) if g > 1 else 0
    if block_bytes is None:
        ws_budget = int(vmem_limit * 0.75)
        per_input = (ws_budget - 2 * ones_bytes) // (2 * (L + 1))   # 2x = double buffering
        per_input = max(64 << 10, min(per_input, 8 << 20))
    else:
        per_input = int(block_bytes)
    tr = _pick_row_tile(R, J, dtype, per_input)
    grid = (R // tr,)

    # Metadata-only views of contiguous NCHW data: (N, C, H, W) -> (R, J).
    xs = [x.reshape(R, J) for x in x_list]

    x_spec = pl.BlockSpec((tr, J), lambda r: (r, 0))
    out_spec = pl.BlockSpec((tr, gout), lambda r: (r, 0))

    x_block = _padded_block_bytes(tr, J, dtype)
    out_block = _padded_block_bytes(tr, gout, dtype)
    needed = 2 * (L * x_block + ones_bytes + out_block) + (2 << 20)
    vmem_limit = int(min(cap, max(vmem_limit, needed)))

    inv_scale = 1.0 / float(HW * L)
    cost = pl.CostEstimate(                        # bandwidth-bound reduction hint for XLA
        flops=2 * L * N * C * HW,
        transcendentals=0,
        bytes_accessed=L * N * C * HW * itemsize + N * C * itemsize + ones_bytes)
    cparams = pltpu.CompilerParams(
        dimension_semantics=("parallel",),         # row tiles shard across TCs on v7x
        vmem_limit_bytes=vmem_limit)

    if g > 1:
        # Block-diagonal selector: sel[k, j] = 1 iff j // HW == k  ->  x @ sel^T gives
        # per-channel spatial sums of the grouped lane-dense row on the MXU.
        sel = jnp.repeat(jnp.eye(g, dtype=jnp.float32), HW, axis=1)      # (g, g*HW)
        sel_spec = pl.BlockSpec((g, J), lambda r: (0, 0))                # resident block
        kernel = functools.partial(_gem_grouped_kernel, eps=float(eps), inv_scale=inv_scale)
        out = pl.pallas_call(
            kernel,
            out_shape=jax.ShapeDtypeStruct((R, gout), dtype),
            grid=grid,
            in_specs=[sel_spec] + [x_spec] * L,
            out_specs=out_spec,
            compiler_params=cparams,
            cost_estimate=cost,
        )(sel, *xs)
    else:
        kernel = functools.partial(_gem_rowsum_kernel, eps=float(eps), inv_scale=inv_scale)
        out = pl.pallas_call(
            kernel,
            out_shape=jax.ShapeDtypeStruct((R, gout), dtype),
            grid=grid,
            in_specs=[x_spec] * L,
            out_specs=out_spec,
            compiler_params=cparams,
            cost_estimate=cost,
        )(*xs)

    return out.reshape(N, C, 1, 1)


# ------------------------------------------------------------------------- reference
def _reference(x_list, eps: float = 1e-6):
    """Pure-JAX reference mirroring the PyTorch forward."""
    outs = []
    for x in x_list:
        xc = jnp.maximum(x, eps)                                     # clamp(min=eps)
        outs.append(jnp.mean(xc.astype(jnp.float32), axis=(2, 3), keepdims=True))
    return jnp.mean(jnp.stack(outs, axis=-1), axis=-1).astype(x_list[0].dtype)


if __name__ == "__main__":
    def _check(x_list, eps=1e-6, **kw):
        out = jax.block_until_ready(generalized_mean_pooling_list(x_list, eps=eps, **kw))
        ref = _reference(x_list, eps=eps)
        N_, C_ = x_list[0].shape[:2]
        assert out.shape == (N_, C_, 1, 1), out.shape
        err = jnp.max(jnp.abs(out - ref))
        assert jnp.allclose(out, ref, atol=1e-5, rtol=1e-5), f"max abs err = {err}"

    # 1) Small module-sized shapes (HW multiple of 128 -> plain row-sum path).
    keys = jax.random.split(jax.random.PRNGKey(0), 3)
    _check([jax.random.normal(k, (2, 4, 16, 16), dtype=jnp.float32) for k in keys])

    # 2) Typical GeM 7x7 feature map: lane-dense channel grouping + MXU segment sum,
    #    multiple ("parallel") grid steps.
    keys = jax.random.split(jax.random.PRNGKey(1), 2)
    _check([jax.random.normal(k, (8, 256, 7, 7), dtype=jnp.float32) for k in keys])

    # 3) Plain path with >= 2 row tiles (exercises row tiling / index maps).
    keys = jax.random.split(jax.random.PRNGKey(2), 2)
    _check([jax.random.normal(k, (4, 64, 16, 16), dtype=jnp.float32) for k in keys])

    print("KERNEL_OK")
</pallas_src>

<mosaic_0001>
module attributes {stable_mosaic.version = 11 : i64} {
  func.func @_gem_rowsum_kernel(%arg0: i32, %arg1: memref<8x256xf32, #tpu.memory_space<vmem>>, %arg2: memref<8x256xf32, #tpu.memory_space<vmem>>, %arg3: memref<8x256xf32, #tpu.memory_space<vmem>>, %arg4: memref<8x1xf32, #tpu.memory_space<vmem>>) attributes {dimension_semantics = [#tpu.dimension_semantics<parallel>], iteration_bounds = array<i64: 1>, scalar_prefetch = 0 : i64, scratch_operands = 0 : i64, tpu.core_type = #tpu.core_type<tc>, window_params = [{transform_indices = @transform_0, window_bounds = array<i64: 8, 256>}, {transform_indices = @transform_1, window_bounds = array<i64: 8, 256>}, {transform_indices = @transform_2, window_bounds = array<i64: 8, 256>}, {transform_indices = @transform_3, window_bounds = array<i64: 8, 1>}]} {
    %cst = arith.constant 0.000000e+00 : f32
    %0 = vector.broadcast %cst : f32 to vector<8x1xf32>
    %c0 = arith.constant 0 : index
    %c0_0 = arith.constant 0 : index
    %1 = vector.load %arg1[%c0, %c0_0] : memref<8x256xf32, #tpu.memory_space<vmem>>, vector<8x256xf32>
    %cst_1 = arith.constant 9.99999997E-7 : f32
    %2 = vector.broadcast %cst_1 : f32 to vector<8x256xf32>
    %3 = arith.maximumf %1, %2 : vector<8x256xf32>
    %cst_2 = arith.constant dense<0.000000e+00> : vector<8xf32>
    %4 = vector.multi_reduction <add>, %3, %cst_2 [1] : vector<8x256xf32> to vector<8xf32>
    %5 = vector.shape_cast %4 : vector<8xf32> to vector<8x1xf32>
    %6 = arith.addf %0, %5 : vector<8x1xf32>
    %c0_3 = arith.constant 0 : index
    %c0_4 = arith.constant 0 : index
    %7 = vector.load %arg2[%c0_3, %c0_4] : memref<8x256xf32, #tpu.memory_space<vmem>>, vector<8x256xf32>
    %cst_5 = arith.constant 9.99999997E-7 : f32
    %8 = vector.broadcast %cst_5 : f32 to vector<8x256xf32>
    %9 = arith.maximumf %7, %8 : vector<8x256xf32>
    %cst_6 = arith.constant dense<0.000000e+00> : vector<8xf32>
    %10 = vector.multi_reduction <add>, %9, %cst_6 [1] : vector<8x256xf32> to vector<8xf32>
    %11 = vector.shape_cast %10 : vector<8xf32> to vector<8x1xf32>
    %12 = arith.addf %6, %11 : vector<8x1xf32>
    %c0_7 = arith.constant 0 : index
    %c0_8 = arith.constant 0 : index
    %13 = vector.load %arg3[%c0_7, %c0_8] : memref<8x256xf32, #tpu.memory_space<vmem>>, vector<8x256xf32>
    %cst_9 = arith.constant 9.99999997E-7 : f32
    %14 = vector.broadcast %cst_9 : f32 to vector<8x256xf32>
    %15 = arith.maximumf %13, %14 : vector<8x256xf32>
    %cst_10 = arith.constant dense<0.000000e+00> : vector<8xf32>
    %16 = vector.multi_reduction <add>, %15, %cst_10 [1] : vector<8x256xf32> to vector<8xf32>
    %17 = vector.shape_cast %16 : vector<8xf32> to vector<8x1xf32>
    %18 = arith.addf %12, %17 : vector<8x1xf32>
    %cst_11 = arith.constant 0.00130208337 : f32
    %19 = vector.broadcast %cst_11 : f32 to vector<8x1xf32>
    %20 = arith.mulf %18, %19 : vector<8x1xf32>
    %c0_12 = arith.constant 0 : index
    %c0_13 = arith.constant 0 : index
    %21 = vector.load %arg4[%c0_12, %c0_13] : memref<8x1xf32, #tpu.memory_space<vmem>>, vector<8x1xf32>
    tpu.vector_store %arg4[%c0_12, %c0_13], %20 {strides = array<i32>} : memref<8x1xf32, #tpu.memory_space<vmem>>, vector<8x1xf32>,
    return
  }
  func.func @transform_0(%arg0: i32) -> (i32, i32) {
    %c0_i32 = arith.constant 0 : i32
    %c0_i32_0 = arith.constant 0 : i32
    return %arg0, %c0_i32 : i32, i32
  }
  func.func @transform_1(%arg0: i32) -> (i32, i32) {
    %c0_i32 = arith.constant 0 : i32
    %c0_i32_0 = arith.constant 0 : i32
    return %arg0, %c0_i32 : i32, i32
  }
  func.func @transform_2(%arg0: i32) -> (i32, i32) {
    %c0_i32 = arith.constant 0 : i32
    %c0_i32_0 = arith.constant 0 : i32
    return %arg0, %c0_i32 : i32, i32
  }
  func.func @transform_3(%arg0: i32) -> (i32, i32) {
    %c0_i32 = arith.constant 0 : i32
    %c0_i32_0 = arith.constant 0 : i32
    return %arg0, %c0_i32 : i32, i32
  }
}

</mosaic_0001>

<bundles_post_ra>
// kernel: tpu_custom_call.1
= control target key start
LH: loop header
LB: loop body
LE: loop exit
PB: predicated region body
PF: predicated region fallthrough
CT: control target
= control target key end

     0   :  { %8 = vsyncpa [#allocation3], 0  ;;  %s217_s0 = inlined_call_operand.hbm [shape: f32[8,256], index: 0, kind: input, shape index: {}]   ;;  %s218_s1 = inlined_call_operand.hbm [shape: f32[8,256], index: 1, kind: input, shape index: {}]   ;;  %s219_s2 = inlined_call_operand.hbm [shape: f32[8,256], index: 2, kind: input, shape index: {}]   ;;  %s220_s3 = inlined_call_operand.vmem [shape: f32[8,1], index: 3, kind: output, shape index: {}]  }
   0x1   :  { %9 = vsyncpa [#allocation5], 0  ;;  %s155_s12 = smov [#allocation4]   ;;  %s156_s14 = smov [#allocation2]  }
   0x2   :  { %s26_s13 = sshll.u32 %s155_s12, 4  ;;  %s16_s15 = sshll.u32 %s156_s14, 4  ;;  %s27_s13 = int_to_ptr.vmem [resolvable:$true] %s26_s13  ;;  %s17_s15 = int_to_ptr.vmem [resolvable:$true] %s16_s15 }
   0x3   :  { %s85_s18 = scalar_lea.hbm %s218_s1, 256 }
   0x4   :  { %p86_p0 = scmp.ne.s32.totalorder %s218_s1, %s85_s18  ;;  %p89_p1 = scmp.lt.u32.totalorder %s85_s18, %s218_s1 }
   0x6   :  { %p91_p2 = pnand %p89_p1, %p86_p0 }
   0x8   :  { %94 = shalt.err (!%p91_p2)
}
   0x9   :  { %s95_s23 = scalar_lea.vmem %s27_s13, 256  ;;  %p100_p4 = scmp.lt.s32.totalorder %s27_s13, %s27_s13 }
   0xa   :  { %p96_p3 = scmp.ne.s32.totalorder %s27_s13, %s95_s23  ;;  %p101_p5 = scmp.lt.s32.totalorder %s95_s23, %s95_s23 }
   0xc   :  { %p102_p6 = por %p101_p5, %p100_p4 }
   0xe   :  { %p103_p7 = pnand %p102_p6, %p96_p3 }
  0x10   :  { %106 = shalt.err (!%p103_p7)
}
  0x11   :  { %29 = dma.hbm_to_vmem [thread:$0]  %s218_s1, 256, %s27_s13, [#allocation5]  }
  0x12   :  { %s107_s28 = scalar_lea.hbm %s217_s0, 256 }
  0x13   :  { %p108_p8 = scmp.ne.s32.totalorder %s217_s0, %s107_s28  ;;  %p111_p9 = scmp.lt.u32.totalorder %s107_s28, %s217_s0 }
  0x15   :  { %p113_p10 = pnand %p111_p9, %p108_p8 }
  0x17   :  { %116 = shalt.err (!%p113_p10)
}
  0x18   :  { %s117_s6 = scalar_lea.vmem %s17_s15, 256  ;;  %p122_p12 = scmp.lt.s32.totalorder %s17_s15, %s17_s15 }
  0x19   :  { %p118_p11 = scmp.ne.s32.totalorder %s17_s15, %s117_s6  ;;  %p123_p13 = scmp.lt.s32.totalorder %s117_s6, %s117_s6 }
  0x1b   :  { %p124_p0 = por %p123_p13, %p122_p12 }
  0x1d   :  { %p125_p1 = pnand %p124_p0, %p118_p11 }
  0x1f   :  { %128 = shalt.err (!%p125_p1)
}
  0x20   :  { %19 = dma.hbm_to_vmem [thread:$0]  %s217_s0, 256, %s17_s15, [#allocation3]  }
  0x21   :  { %s157_s8 = smov [#allocation6]   ;;  %s129_s12 = scalar_lea.hbm %s219_s2, 256 }
  0x22   :  { %s36_s9 = sshll.u32 %s157_s8, 4  ;;  %p130_p2 = scmp.ne.s32.totalorder %s219_s2, %s129_s12  ;;  %s37_s9 = int_to_ptr.vmem [resolvable:$true] %s36_s9 }
  0x23   :  { %p133_p3 = scmp.lt.u32.totalorder %s129_s12, %s219_s2 }
  0x25   :  { %p135_p4 = pnand %p133_p3, %p130_p2 }
  0x27   :  { %138 = shalt.err (!%p135_p4)
}
  0x28   :  { %s139_s18 = scalar_lea.vmem %s37_s9, 256  ;;  %p144_p6 = scmp.lt.s32.totalorder %s37_s9, %s37_s9 }
  0x29   :  { %p140_p5 = scmp.ne.s32.totalorder %s37_s9, %s139_s18  ;;  %p145_p7 = scmp.lt.s32.totalorder %s139_s18, %s139_s18 }
  0x2b   :  { %p146_p8 = por %p145_p7, %p144_p6 }
  0x2d   :  { %p147_p9 = pnand %p146_p8, %p140_p5 }
  0x2f   :  { %150 = shalt.err (!%p147_p9)
}
  0x30   :  { %39 = dma.hbm_to_vmem [thread:$0]  %s219_s2, 256, %s37_s9, [#allocation5]  }
  0x31   :  { %151 = dma.done.wait [#allocation3], 256  }
  0x32   :  { %152 = vsyncadd [#allocation3], 4294967040 }
  0x33   :  { %153 = dma.done.wait [#allocation5], 512  }
  0x34   :  { %154 = vsyncadd [#allocation5], 4294966784  ;;  %v49_v0 = vld [vmem:[#allocation2] sm:$0xff]  ;;  %v50_v1 = vld [vmem:[#allocation2 + $0x8] sm:$0xff]  ;;  %vm74_vm0 = vcmask 7168  }
  0x35   :  { %v57_v2 = vld [vmem:[#allocation4] sm:$0xff]  ;;  %v51_v3 = vmax.f32 %v49_v0, 1e-06  ;;  %v52_v4 = vmax.f32 %v50_v1, 1e-06  ;;  %v58_v5 = vld [vmem:[#allocation4 + $0x8] sm:$0xff] }
  0x36   :  { %v65_v6 = vld [vmem:[#allocation6] sm:$0xff]  ;;  %v59_v7 = vmax.f32 %v57_v2, 1e-06  ;;  %v60_v8 = vmax.f32 %v58_v5, 1e-06  ;;  %v66_v9 = vld [vmem:[#allocation6 + $0x8] sm:$0xff] }
  0x37   :  { %v53_v10 = vadd.f32 %v52_v4, %v51_v3  ;;  %v67_v11 = vmax.f32 %v65_v6, 1e-06  ;;  %v68_v12 = vmax.f32 %v66_v9, 1e-06 }
  0x38   :  { %v61_v13 = vadd.f32 %v60_v8, %v59_v7 }
  0x39   :  { %54 = vadd.xlane.f32.xlu0 %v53_v10  ;;  %v69_v14 = vadd.f32 %v68_v12, %v67_v11 }
  0x3b   :  { %70 = vadd.xlane.f32.xlu1 %v69_v14 }
  0x3d   :  { %62 = vadd.xlane.f32.xlu0 %v61_v13 }
  0xc6   :  { %v55_v15 = vpop.xlane.xlu0 %54 }
  0xc8   :  { %v71_v17 = vpop.xlane.xlu1 %70 }
  0xca   :  { %v63_v16 = vpop.xlane.xlu0 %62 }
  0xcb   :  { %v64_v18 = vadd.f32 %v63_v16, %v55_v15 }
  0xcd   :  { %v72_v19 = vadd.f32 %v71_v17, %v64_v18 }
  0xcf   :  { %v73_v20 = vmul.f32 0.0013020834, %v72_v19 }
  0xd1   :  { %75 = vst.msk [vmem:[%s220_s3] sm:$0xff] %vm74_vm0, %v73_v20 }
  0xd2   :  { %80 = vsyncpa [#allocation3], 1 }
  0xd3   :  { %81 = vsyncpa [#allocation5], 1 }

</bundles_post_ra>
